<compile_context>
chip_gen: v7x
topology: tpu7x:2x2x1
jax: 0.10.0
libtpu: 0.0.40
codegen_flags: <defaults>
</compile_context>

<pallas_src>
import functools

import jax
import jax.numpy as jnp
from jax.experimental import pallas as pl
from jax.experimental.pallas import tpu as pltpu


def _round_up(x, m):
    return ((x + m - 1) // m) * m


def _tpu_policy():
    """Per-generation (tm_default, vmem_limit_bytes, bf16_transcendentals)."""
    vmem_bytes = None
    try:
        vmem_bytes = int(pltpu.get_tpu_info().vmem_capacity_bytes)
    except Exception:
        vmem_bytes = None
    kind = ""
    try:
        kind = jax.devices()[0].device_kind.lower()
    except Exception:
        pass
    if vmem_bytes is None:
        # v7x-class parts have 64 MiB per TC; v5e/v6e have 128 MiB.
        vmem_bytes = 64 * 1024 * 1024 if "7" in kind else 128 * 1024 * 1024
    small_vmem = vmem_bytes <= 80 * 1024 * 1024
    bf16_eup = "v5" not in kind  # v6e/v7x have a bf16 EUP; v5e does not.
    if small_vmem:
        return 256, 56 * 1024 * 1024, bf16_eup
    return 512, 96 * 1024 * 1024, bf16_eup


def _norm_mlp_kernel(x_ref, w1_ref, b1_ref, w2_ref, b2_ref, o_ref, *, bf16_eup):
    """LayerNorm (affine pre-folded into W1/b1) + Linear + Tanh + Linear + GLU, one row tile."""
    x = x_ref[...].astype(jnp.float32)                         # (TM, E)

    # LayerNorm statistics (biased variance, eps=1e-5, like nn.LayerNorm).
    mean = jnp.mean(x, axis=-1, keepdims=True)
    ex2 = jnp.mean(x * x, axis=-1, keepdims=True)
    var = jnp.maximum(ex2 - mean * mean, 0.0)
    xn = (x - mean) * jax.lax.rsqrt(var + 1e-5)                # (TM, E) f32
    # gamma/beta are folded into w1_ref / b1_ref by the wrapper.

    # hidden: Linear(E -> M) + Tanh.  bf16 MXU inputs, f32 accumulation.
    h = jnp.dot(xn.astype(jnp.bfloat16), w1_ref[...],
                preferred_element_type=jnp.float32) + b1_ref[...]
    if bf16_eup:
        h16 = jnp.tanh(h.astype(jnp.bfloat16))                 # bf16 EUP (v6e/v7x)
    else:
        h16 = jnp.tanh(h).astype(jnp.bfloat16)                 # f32 EUP (v5e)

    # output: one Linear(M -> 2*O_pad) matmul; GLU halves are a free 128-aligned slice.
    y = jnp.dot(h16, w2_ref[...], preferred_element_type=jnp.float32) + b2_ref[...]
    o_pad = o_ref.shape[-1]
    a = y[:, :o_pad]
    b = y[:, o_pad:]
    if bf16_eup:
        gate = jax.nn.sigmoid(b.astype(jnp.bfloat16)).astype(jnp.float32)
    else:
        gate = jax.nn.sigmoid(b)
    o_ref[...] = (a * gate).astype(o_ref.dtype)                # (TM, O_pad)


@functools.partial(
    jax.jit,
    static_argnames=("tm", "vmem_limit", "bf16_eup", "single_buffer_weights"))
def _norm_mlp_rows_impl(x2d, w1, b1, w2, b2,
                        *, tm, vmem_limit, bf16_eup, single_buffer_weights):
    rows, emb_dim = x2d.shape
    mlp_dim = w1.shape[1]
    out_pad = w2.shape[1] // 2          # already a multiple of 128 (wrapper pads)

    # Row tile: clamp to the 8-rounded row count, keep it a multiple of 8, and make sure
    # the grid has at least 2 steps whenever possible so v7x's two TCs both get work.
    tm_eff = min(tm, _round_up(rows, 8))
    tm_eff = max(8, (tm_eff // 8) * 8)
    padded_rows = _round_up(rows, tm_eff)
    if padded_rows // tm_eff < 2 and tm_eff > 8:
        tm_eff = max(8, _round_up(tm_eff // 2, 8))
        padded_rows = _round_up(rows, tm_eff)
    if padded_rows != rows:
        x2d = jnp.pad(x2d, ((0, padded_rows - rows), (0, 0)))

    grid = (padded_rows // tm_eff,)

    def _const_spec(shape):
        # Grid-invariant operand: single-buffer it if supported (halves resident-weight
        # VMEM, important on v7x's 64 MiB).
        if single_buffer_weights:
            return pl.BlockSpec(shape, lambda i: (0, 0), pipeline_mode=pl.Buffered(1))
        return pl.BlockSpec(shape, lambda i: (0, 0))

    in_specs = [
        pl.BlockSpec((tm_eff, emb_dim), lambda i: (i, 0)),   # x tile
        _const_spec((emb_dim, mlp_dim)),                     # W1' (bf16, gamma folded)
        _const_spec((1, mlp_dim)),                           # b1' (beta folded)
        _const_spec((mlp_dim, 2 * out_pad)),                 # W2 (bf16, GLU halves padded)
        _const_spec((1, 2 * out_pad)),                       # b2
    ]

    flops = (2 * padded_rows * (emb_dim * mlp_dim + 2 * mlp_dim * out_pad)
             + 10 * padded_rows * emb_dim)
    transcendentals = padded_rows * (mlp_dim + out_pad)
    bytes_accessed = (padded_rows * emb_dim * 4               # x
                      + padded_rows * out_pad * 4             # out
                      + emb_dim * mlp_dim * 2                 # W1 bf16
                      + 2 * mlp_dim * out_pad * 2             # W2 bf16
                      + (mlp_dim + 2 * out_pad) * 4)          # biases

    out = pl.pallas_call(
        functools.partial(_norm_mlp_kernel, bf16_eup=bf16_eup),
        out_shape=jax.ShapeDtypeStruct((padded_rows, out_pad), jnp.float32),
        grid_spec=pltpu.PrefetchScalarGridSpec(
            num_scalar_prefetch=0,
            grid=grid,
            in_specs=in_specs,
            out_specs=pl.BlockSpec((tm_eff, out_pad), lambda i: (i, 0)),
        ),
        compiler_params=pltpu.CompilerParams(
            dimension_semantics=("parallel",),
            vmem_limit_bytes=int(vmem_limit),
        ),
        cost_estimate=pl.CostEstimate(
            flops=int(flops),
            transcendentals=int(transcendentals),
            bytes_accessed=int(bytes_accessed),
        ),
    )(x2d, w1, b1, w2, b2)

    if padded_rows != rows:
        out = out[:rows]
    return out


def norm_mlp_rows(x2d, gamma, beta, w1, b1, w2, b2, *, tm=None):
    """x2d: (rows, emb_dim) -> (rows, out_dim) where out_dim = w2.shape[1] // 2."""
    tm_default, vmem_limit, bf16_eup = _tpu_policy()
    if tm is None:
        tm = tm_default

    half = w2.shape[1] // 2
    out_dim = half
    out_pad = _round_up(max(out_dim, 1), 128)

    # Fold the LayerNorm affine into the first linear (in f32, once).
    w1f = (gamma.reshape(-1, 1).astype(jnp.float32) * w1.astype(jnp.float32))
    b1f = beta.reshape(1, -1).astype(jnp.float32) @ w1.astype(jnp.float32) + b1

    # Split the GLU halves, zero-pad each half's columns to a multiple of 128 so the
    # output store is lane-dense, then concatenate back for a single MXU matmul.
    w2a, w2b = w2[:, :half], w2[:, half:]
    b2a, b2b = b2[:, :half], b2[:, half:]
    pad_cols = out_pad - out_dim
    if pad_cols:
        w2a = jnp.pad(w2a, ((0, 0), (0, pad_cols)))
        w2b = jnp.pad(w2b, ((0, 0), (0, pad_cols)))
        b2a = jnp.pad(b2a, ((0, 0), (0, pad_cols)))
        b2b = jnp.pad(b2b, ((0, 0), (0, pad_cols)))
    w2c = jnp.concatenate([w2a, w2b], axis=1).astype(jnp.bfloat16)   # (M, 2*out_pad)
    b2c = jnp.concatenate([b2a, b2b], axis=1).astype(jnp.float32)    # (1, 2*out_pad)

    args = (x2d, w1f.astype(jnp.bfloat16), b1f, w2c, b2c)
    try:
        out = _norm_mlp_rows_impl(*args, tm=tm, vmem_limit=vmem_limit,
                                  bf16_eup=bf16_eup, single_buffer_weights=True)
    except Exception as e:
        # Only fall back when Buffered(1) itself is rejected; anything else re-raises.
        msg = (str(e) + type(e).__name__).lower()
        if ("buffer" not in msg) and ("pipeline" not in msg):
            raise
        # Double-buffered weights double resident VMEM; halve tm to stay safe on v7x.
        out = _norm_mlp_rows_impl(*args, tm=max(8, tm // 2), vmem_limit=vmem_limit,
                                  bf16_eup=bf16_eup, single_buffer_weights=False)

    if out_pad != out_dim:
        out = out[:, :out_dim]
    return out


def norm_mlp_forward(qb, params, *, in_channels, bandwidth, complex_mask=True, tm=None):
    """qb: (batch, n_time, emb_dim) -> complex (batch, in_channels, bandwidth, n_time)
    (or real (batch, in_channels, bandwidth, n_time) if complex_mask=False)."""
    batch, n_time, emb_dim = qb.shape

    x2d = qb.reshape(batch * n_time, emb_dim)
    mb = norm_mlp_rows(
        x2d,
        params["gamma"], params["beta"],
        params["w1"], params["b1"],
        params["w2"], params["b2"],
        tm=tm,
    )  # (batch*n_time, in_channels*bandwidth*reim)

    # Matches torch: reshape(B,T,C,F,2) -> view_as_complex (last dim = [re, im]) -> permute.
    if complex_mask:
        mb = mb.reshape(batch, n_time, in_channels, bandwidth, 2)
        mb = jax.lax.complex(mb[..., 0], mb[..., 1])
    else:
        mb = mb.reshape(batch, n_time, in_channels, bandwidth)
    mb = jnp.transpose(mb, (0, 2, 3, 1))                       # (B, C, F, T)
    return mb


def init_params(key, emb_dim, mlp_dim, bandwidth, in_channels, reim=2):
    out2 = bandwidth * in_channels * reim * 2
    k1, k2, k3, k4 = jax.random.split(key, 4)
    s1 = 1.0 / jnp.sqrt(emb_dim)
    s2 = 1.0 / jnp.sqrt(mlp_dim)
    return {
        "gamma": jnp.ones((1, emb_dim), jnp.float32),
        "beta": jnp.zeros((1, emb_dim), jnp.float32),
        "w1": jax.random.uniform(k1, (emb_dim, mlp_dim), jnp.float32, -s1, s1),
        "b1": jax.random.uniform(k2, (1, mlp_dim), jnp.float32, -s1, s1),
        "w2": jax.random.uniform(k3, (mlp_dim, out2), jnp.float32, -s2, s2),
        "b2": jax.random.uniform(k4, (1, out2), jnp.float32, -s2, s2),
    }


def _reference(qb, params):
    """Pure-JAX f32 reference of norm -> hidden -> output (pre-reshape), no folding."""
    x = qb
    mean = jnp.mean(x, axis=-1, keepdims=True)
    var = jnp.mean((x - mean) ** 2, axis=-1, keepdims=True)
    xn = (x - mean) / jnp.sqrt(var + 1e-5)
    xn = xn * params["gamma"][0] + params["beta"][0]
    h = jnp.tanh(xn @ params["w1"] + params["b1"][0])
    y = h @ params["w2"] + params["b2"][0]
    half = y.shape[-1] // 2
    return y[..., :half] * jax.nn.sigmoid(y[..., half:])


if __name__ == "__main__":
    # Small shapes consistent with the module.
    batch, n_time = 2, 8
    emb_dim, mlp_dim = 32, 32
    bandwidth, in_channels = 16, 2
    complex_mask = True
    reim = 2 if complex_mask else 1

    key = jax.random.PRNGKey(0)
    kx, kp = jax.random.split(key)
    qb = jax.random.normal(kx, (batch, n_time, emb_dim), jnp.float32)
    params = init_params(kp, emb_dim, mlp_dim, bandwidth, in_channels, reim)

    out = norm_mlp_forward(qb, params, in_channels=in_channels,
                           bandwidth=bandwidth, complex_mask=complex_mask)
    out = jax.block_until_ready(out)

    # Validate against the f32 pure-JAX reference (kernel uses bf16 MXU inputs with
    # f32 accumulation, so tolerance is relaxed accordingly).
    ref = _reference(qb, params)
    ref = ref.reshape(batch, n_time, in_channels, bandwidth, 2)
    ref = jax.lax.complex(ref[..., 0], ref[..., 1])
    ref = jnp.transpose(ref, (0, 2, 3, 1))

    assert out.shape == (batch, in_channels, bandwidth, n_time), out.shape
    assert out.dtype == jnp.complex64, out.dtype
    assert jnp.allclose(out, ref, atol=5e-2, rtol=5e-2), float(jnp.max(jnp.abs(out - ref)))

    print("KERNEL_OK")
</pallas_src>

<mosaic_0001>
module attributes {stable_mosaic.version = 11 : i64} {
  func.func @_norm_mlp_kernel(%arg0: i32, %arg1: memref<8x32xf32, #tpu.memory_space<vmem>>, %arg2: memref<32x32xbf16, #tpu.memory_space<vmem>>, %arg3: memref<1x32xf32, #tpu.memory_space<vmem>>, %arg4: memref<32x256xbf16, #tpu.memory_space<vmem>>, %arg5: memref<1x256xf32, #tpu.memory_space<vmem>>, %arg6: memref<8x128xf32, #tpu.memory_space<vmem>>) attributes {dimension_semantics = [#tpu.dimension_semantics<parallel>], iteration_bounds = array<i64: 2>, scalar_prefetch = 0 : i64, scratch_operands = 0 : i64, tpu.core_type = #tpu.core_type<tc>, window_params = [{transform_indices = @transform_0, window_bounds = array<i64: 8, 32>}, {pipeline_mode = #tpu.pipeline_mode<synchronous>, transform_indices = @transform_1, window_bounds = array<i64: 32, 32>}, {pipeline_mode = #tpu.pipeline_mode<synchronous>, transform_indices = @transform_2, window_bounds = array<i64: 1, 32>}, {pipeline_mode = #tpu.pipeline_mode<synchronous>, transform_indices = @transform_3, window_bounds = array<i64: 32, 256>}, {pipeline_mode = #tpu.pipeline_mode<synchronous>, transform_indices = @transform_4, window_bounds = array<i64: 1, 256>}, {transform_indices = @transform_5, window_bounds = array<i64: 8, 128>}]} {
    %c0 = arith.constant 0 : index
    %c0_0 = arith.constant 0 : index
    %0 = vector.load %arg1[%c0, %c0_0] : memref<8x32xf32, #tpu.memory_space<vmem>>, vector<8x32xf32>
    %cst = arith.constant dense<0.000000e+00> : vector<8xf32>
    %1 = vector.multi_reduction <add>, %0, %cst [1] : vector<8x32xf32> to vector<8xf32>
    %2 = vector.shape_cast %1 : vector<8xf32> to vector<8x1xf32>
    %cst_1 = arith.constant 3.200000e+01 : f32
    %3 = vector.broadcast %cst_1 : f32 to vector<8x1xf32>
    %4 = arith.divf %2, %3 : vector<8x1xf32>
    %5 = arith.mulf %0, %0 : vector<8x32xf32>
    %cst_2 = arith.constant dense<0.000000e+00> : vector<8xf32>
    %6 = vector.multi_reduction <add>, %5, %cst_2 [1] : vector<8x32xf32> to vector<8xf32>
    %7 = vector.shape_cast %6 : vector<8xf32> to vector<8x1xf32>
    %cst_3 = arith.constant 3.200000e+01 : f32
    %8 = vector.broadcast %cst_3 : f32 to vector<8x1xf32>
    %9 = arith.divf %7, %8 : vector<8x1xf32>
    %10 = arith.mulf %4, %4 : vector<8x1xf32>
    %11 = arith.subf %9, %10 : vector<8x1xf32>
    %cst_4 = arith.constant 0.000000e+00 : f32
    %12 = vector.broadcast %cst_4 : f32 to vector<8x1xf32>
    %13 = arith.maximumf %11, %12 : vector<8x1xf32>
    %14 = vector.broadcast %4 : vector<8x1xf32> to vector<8x32xf32>
    %15 = arith.subf %0, %14 : vector<8x32xf32>
    %cst_5 = arith.constant 9.99999974E-6 : f32
    %16 = vector.broadcast %cst_5 : f32 to vector<8x1xf32>
    %17 = arith.addf %13, %16 : vector<8x1xf32>
    %18 = math.rsqrt %17 : vector<8x1xf32>
    %19 = vector.broadcast %18 : vector<8x1xf32> to vector<8x32xf32>
    %20 = arith.mulf %15, %19 : vector<8x32xf32>
    %21 = arith.truncf %20 : vector<8x32xf32> to vector<8x32xbf16>
    %c0_6 = arith.constant 0 : index
    %c0_7 = arith.constant 0 : index
    %22 = vector.load %arg2[%c0_6, %c0_7] : memref<32x32xbf16, #tpu.memory_space<vmem>>, vector<32x32xbf16>
    %cst_8 = arith.constant dense<0.000000e+00> : vector<8x32xf32>
    %23 = tpu.matmul %21, %22, %cst_8 {dimension_numbers = #tpu.dot_dimension_numbers<[1], [0], [0], [1], [0, 0, 1, 1], [], []>} : vector<8x32xbf16>, vector<32x32xbf16>, vector<8x32xf32> -> vector<8x32xf32>
    %c0_9 = arith.constant 0 : index
    %c0_10 = arith.constant 0 : index
    %24 = vector.load %arg3[%c0_9, %c0_10] : memref<1x32xf32, #tpu.memory_space<vmem>>, vector<1x32xf32>
    %25 = vector.broadcast %24 : vector<1x32xf32> to vector<8x32xf32>
    %26 = arith.addf %23, %25 : vector<8x32xf32>
    %27 = arith.truncf %26 : vector<8x32xf32> to vector<8x32xbf16>
    %28 = math.tanh %27 : vector<8x32xbf16>
    %c0_11 = arith.constant 0 : index
    %c0_12 = arith.constant 0 : index
    %29 = vector.load %arg4[%c0_11, %c0_12] : memref<32x256xbf16, #tpu.memory_space<vmem>>, vector<32x256xbf16>
    %cst_13 = arith.constant dense<0.000000e+00> : vector<8x256xf32>
    %30 = tpu.matmul %28, %29, %cst_13 {dimension_numbers = #tpu.dot_dimension_numbers<[1], [0], [0], [1], [0, 0, 1, 1], [], []>} : vector<8x32xbf16>, vector<32x256xbf16>, vector<8x256xf32> -> vector<8x256xf32>
    %c0_14 = arith.constant 0 : index
    %c0_15 = arith.constant 0 : index
    %31 = vector.load %arg5[%c0_14, %c0_15] : memref<1x256xf32, #tpu.memory_space<vmem>>, vector<1x256xf32>
    %32 = vector.broadcast %31 : vector<1x256xf32> to vector<8x256xf32>
    %33 = arith.addf %30, %32 : vector<8x256xf32>
    %34 = vector.extract_strided_slice %33 {offsets = [0, 0], sizes = [8, 128], strides = [1, 1]} : vector<8x256xf32> to vector<8x128xf32>
    %35 = vector.extract_strided_slice %33 {offsets = [0, 128], sizes = [8, 128], strides = [1, 1]} : vector<8x256xf32> to vector<8x128xf32>
    %36 = arith.truncf %35 : vector<8x128xf32> to vector<8x128xbf16>
    %37 = arith.negf %36 : vector<8x128xbf16>
    %38 = math.exp %37 : vector<8x128xbf16>
    %cst_16 = arith.constant 1.000000e+00 : bf16
    %39 = vector.broadcast %cst_16 : bf16 to vector<8x128xbf16>
    %40 = arith.addf %39, %38 : vector<8x128xbf16>
    %41 = arith.divf %39, %40 : vector<8x128xbf16>
    %42 = arith.extf %41 : vector<8x128xbf16> to vector<8x128xf32>
    %43 = arith.mulf %34, %42 : vector<8x128xf32>
    %c0_17 = arith.constant 0 : index
    %c0_18 = arith.constant 0 : index
    %44 = vector.load %arg6[%c0_17, %c0_18] : memref<8x128xf32, #tpu.memory_space<vmem>>, vector<8x128xf32>
    tpu.vector_store %arg6[%c0_17, %c0_18], %43 {strides = array<i32>} : memref<8x128xf32, #tpu.memory_space<vmem>>, vector<8x128xf32>,
    return
  }
  func.func @transform_0(%arg0: i32) -> (i32, i32) {
    %c0_i32 = arith.constant 0 : i32
    %c0_i32_0 = arith.constant 0 : i32
    return %arg0, %c0_i32 : i32, i32
  }
  func.func @transform_1(%arg0: i32) -> (i32, i32) {
    %c0_i32 = arith.constant 0 : i32
    %c0_i32_0 = arith.constant 0 : i32
    %c0_i32_1 = arith.constant 0 : i32
    return %c0_i32, %c0_i32_0 : i32, i32
  }
  func.func @transform_2(%arg0: i32) -> (i32, i32) {
    %c0_i32 = arith.constant 0 : i32
    %c0_i32_0 = arith.constant 0 : i32
    %c0_i32_1 = arith.constant 0 : i32
    return %c0_i32, %c0_i32_0 : i32, i32
  }
  func.func @transform_3(%arg0: i32) -> (i32, i32) {
    %c0_i32 = arith.constant 0 : i32
    %c0_i32_0 = arith.constant 0 : i32
    %c0_i32_1 = arith.constant 0 : i32
    return %c0_i32, %c0_i32_0 : i32, i32
  }
  func.func @transform_4(%arg0: i32) -> (i32, i32) {
    %c0_i32 = arith.constant 0 : i32
    %c0_i32_0 = arith.constant 0 : i32
    %c0_i32_1 = arith.constant 0 : i32
    return %c0_i32, %c0_i32_0 : i32, i32
  }
  func.func @transform_5(%arg0: i32) -> (i32, i32) {
    %c0_i32 = arith.constant 0 : i32
    %c0_i32_0 = arith.constant 0 : i32
    return %arg0, %c0_i32 : i32, i32
  }
}

</mosaic_0001>

<bundles_post_ra>
// kernel: _norm_mlp_rows_impl.1
= control target key start
LH: loop header
LB: loop body
LE: loop exit
PB: predicated region body
PF: predicated region fallthrough
CT: control target
= control target key end

     0   :  { %10 = vsyncpa [#allocation3], 0  ;;  %s1293_s0 = inlined_call_operand.hbm [shape: f32[16,32], index: 0, kind: input, shape index: {}]   ;;  %s1294_s1 = inlined_call_operand.hbm [shape: bf16[32,32], index: 1, kind: input, shape index: {}]   ;;  %s1295_s2 = inlined_call_operand.hbm [shape: f32[1,32], index: 2, kind: input, shape index: {}]   ;;  %s1296_s3 = inlined_call_operand.hbm [shape: bf16[32,256], index: 3, kind: input, shape index: {}]   ;;  %s1297_s4 = inlined_call_operand.hbm [shape: f32[1,256], index: 4, kind: input, shape index: {}]   ;;  %s1298_s5 = inlined_call_operand.hbm [shape: f32[16,128], index: 5, kind: output, shape index: {}]  }
   0x1   :  { %12 = vsyncpa [#allocation3 + $0x1], 0 }
   0x2   :  { %13 = vsyncpa [#allocation6], 0 }
   0x3   :  { %14 = vsyncpa [#allocation9], 0 }
   0x4   :  { %15 = vsyncpa [#allocation4], 0 }
   0x5   :  { %17 = vsyncpa [#allocation4 + $0x1], 0  ;;  %s1009_s18 = smov 0   ;;  %s1011_s19 = smov 0  }
   0x6   :  { %s1013_s20 = smov 0   ;;  %s1015_s21 = smov 0  }
   0x7 LB: > { %s966_s22 = smov [#allocation5]   ;;  %s1030_s24 = sadd.s32 4294967295, %s964_s21   ;;  %s964_s21 = sphi %s1015_s21, %s1322_s21   ;;  %s960_s20 = sphi %s1013_s20, %s1321_s20   ;;  %s956_s19 = sphi %s1011_s19, %s1320_s19   ;;  %s952_s18 = sphi %s1009_s18, %s1319_s18  }
   0x8   : > { %s176_s23 = sshll.u32 %s966_s22, 4  ;;  %p598_p0 = scmp.ge.s32.totalorder %s964_s21, 1  ;;  %s1035_s23 = int_to_ptr.vmem [resolvable:$true] %s176_s23 }
   0x9   : > { %p1299_p1 = scmp.eq.s32.totalorder %s1030_s24, 0  ;;  %p164_p2 = scmp.lt.s32.totalorder %s964_s21, 3 }
   0xa   : > { %s967_s26 = smov [#allocation8]   ;;  %s968_s29 = smov [#allocation7]  }
   0xb   : > { %p1037_p3 = pnand %p598_p0, %p164_p2  ;;  %s200_s27 = sshll.u32 %s967_s26, 4  ;;  %s1050_s27 = int_to_ptr.vmem [resolvable:$true] %s200_s27 }
   0xc   : > { %s1052_s30 = sshll.u32 %s968_s29, 4  ;;  %s748_s8 = scalar_lea.hbm %s1294_s1, 256  ;;  %s191_s30 = int_to_ptr.vmem [resolvable:$true] %s1052_s30 }
   0xd   : > { %s1302_s25 = scalar_select %p1037_p3, 1, 0 }
   0xe   : > { %p658_p5 = pneg %p1037_p3  ;;  %p749_p7 = scmp.ne.s32.totalorder %s1294_s1, %s748_s8 }
   0xf   : > { %p755_p11 = scmp.lt.u32.totalorder %s748_s8, %s1294_s1 }
  0x10   : > { %p1046_p6 = pnand %p658_p5, %p1299_p1 }
  0x12   : > { %p1062_p8 = pneg %p1046_p6 }
  0x14   : > { %p751_p9 = pnand %p1062_p8, %p749_p7 }
  0x16   : > { %p752_p10 = pneg %p751_p9 }
  0x18   : > { %p757_p12 = pnand %p755_p11, %p752_p10 }
  0x1a   : > { %760 = shalt.err (!%p757_p12)
}
  0x1b   : > { %s761_s14 = scalar_lea.vmem %s1035_s23, 256  ;;  %p769_p5 = scmp.lt.s32.totalorder %s1035_s23, %s1035_s23 }
  0x1c   : > { %p762_p13 = scmp.ne.s32.totalorder %s1035_s23, %s761_s14  ;;  %p770_p4 = scmp.lt.s32.totalorder %s761_s14, %s761_s14 }
  0x1e   : > { %p764_p0 = pnand %p762_p13, %p1062_p8  ;;  %p771_p7 = por %p770_p4, %p769_p5 }
  0x20   : > { %p765_p2 = pneg %p764_p0 }
  0x22   : > { %p772_p9 = pnand %p771_p7, %p765_p2 }
  0x24   : > { %775 = shalt.err (!%p772_p9)
}
  0x25   : > { %s969_s15 = smov 64   ;;  %s970_s16 = smov 4  }
  0x26   : > { %661 = dma.hbm_to_vmem [thread:$0]  (!%p1046_p6), %s1294_s1, 256, %s1035_s23, [#allocation6], %s969_s15, %s969_s15, %s970_s16  }
  0x27   : > { %s776_s6 = scalar_lea.hbm %s1296_s3, 512 }
  0x28   : > { %p777_p4 = scmp.ne.s32.totalorder %s1296_s3, %s776_s6  ;;  %p783_p12 = scmp.lt.u32.totalorder %s776_s6, %s1296_s3 }
  0x2a   : > { %p779_p10 = pnand %p777_p4, %p1062_p8 }
  0x2c   : > { %p780_p11 = pneg %p779_p10 }
  0x2e   : > { %p785_p13 = pnand %p783_p12, %p780_p11 }
  0x30   : > { %788 = shalt.err (!%p785_p13)
}
  0x31   : > { %s789_s23 = scalar_lea.vmem %s1050_s27, 512  ;;  %p797_p7 = scmp.lt.s32.totalorder %s1050_s27, %s1050_s27 }
  0x32   : > { %p790_p0 = scmp.ne.s32.totalorder %s1050_s27, %s789_s23  ;;  %p798_p9 = scmp.lt.s32.totalorder %s789_s23, %s789_s23 }
  0x34   : > { %p792_p2 = pnand %p790_p0, %p1062_p8  ;;  %p799_p4 = por %p798_p9, %p797_p7 }
  0x36   : > { %p793_p5 = pneg %p792_p2 }
  0x38   : > { %p800_p10 = pnand %p799_p4, %p793_p5 }
  0x3a   : > { %803 = shalt.err (!%p800_p10)
}
  0x3b   : > { %s971_s12 = smov 128   ;;  %s972_s13 = smov 8  }
  0x3c   : > { %667 = dma.hbm_to_vmem [thread:$0]  (!%p1046_p6), %s1296_s3, 512, %s1050_s27, [#allocation9], %s971_s12, %s971_s12, %s972_s13  }
  0x3d   : > { %s804_s22 = scalar_lea.hbm %s1295_s2, 16 }
  0x3e   : > { %p805_p11 = scmp.ne.s32.totalorder %s1295_s2, %s804_s22  ;;  %p811_p0 = scmp.lt.u32.totalorder %s804_s22, %s1295_s2 }
  0x40   : > { %p807_p12 = pnand %p805_p11, %p1062_p8 }
  0x42   : > { %p808_p13 = pneg %p807_p12 }
  0x44   : > { %p813_p2 = pnand %p811_p0, %p808_p13 }
  0x46   : > { %816 = shalt.err (!%p813_p2)
}
  0x47   : > { %s817_s8 = scalar_lea.vmem %s191_s30, 16  ;;  %s824_s27 = scalar_lea.vmem %s191_s30, 32 }
  0x48   : > { %p818_p5 = scmp.ne.s32.totalorder %s191_s30, %s817_s8  ;;  %p825_p4 = scmp.lt.s32.totalorder %s191_s30, %s191_s30 }
  0x49   : > { %p826_p10 = scmp.lt.s32.totalorder %s824_s27, %s817_s8 }
  0x4a   : > { %p820_p7 = pnand %p818_p5, %p1062_p8 }
  0x4b   : > { %p827_p1 = por %p826_p10, %p825_p4 }
  0x4c   : > { %p821_p9 = pneg %p820_p7 }
  0x4e   : > { %p828_p3 = pnand %p827_p1, %p821_p9 }
  0x50   : > { %831 = shalt.err (!%p828_p3)
}
  0x51   : > { %664 = dma.hbm_to_vmem [thread:$0]  (!%p1046_p6), %s1295_s2, 16, %s191_s30, [#allocation6]  }
  0x52   : > { %s973_s23 = smov [#allocation10]   ;;  %s832_s15 = scalar_lea.hbm %s1297_s4, 32 }
  0x53   : > { %s214_s12 = sshll.u32 %s973_s23, 4  ;;  %p833_p11 = scmp.ne.s32.totalorder %s1297_s4, %s832_s15  ;;  %s215_s12 = int_to_ptr.vmem [resolvable:$true] %s214_s12 }
  0x54   : > { %p839_p12 = scmp.lt.u32.totalorder %s832_s15, %s1297_s4 }
  0x55   : > { %p835_p1 = pnand %p833_p11, %p1062_p8 }
  0x57   : > { %p836_p3 = pneg %p835_p1 }
  0x59   : > { %p841_p13 = pnand %p839_p12, %p836_p3 }
  0x5b   : > { %844 = shalt.err (!%p841_p13)
}
  0x5c   : > { %s845_s30 = scalar_lea.vmem %s215_s12, 32  ;;  %p853_p7 = scmp.lt.s32.totalorder %s215_s12, %s215_s12 }
  0x5d   : > { %p846_p0 = scmp.ne.s32.totalorder %s215_s12, %s845_s30  ;;  %p854_p9 = scmp.lt.s32.totalorder %s845_s30, %s845_s30 }
  0x5f   : > { %p848_p2 = pnand %p846_p0, %p1062_p8  ;;  %p855_p4 = por %p854_p9, %p853_p7 }
  0x61   : > { %p849_p5 = pneg %p848_p2 }
  0x63   : > { %p856_p10 = pnand %p855_p4, %p849_p5 }
  0x65   : > { %859 = shalt.err (!%p856_p10)
}
  0x66   : > { %670 = dma.hbm_to_vmem [thread:$0]  (!%p1046_p6), %s1297_s4, 32, %s215_s12, [#allocation9]  }
  0x67   : > { %s597_s11 = sadd.s32 4294967294, %s964_s21   ;;  %s1145_s28 = sadd.s32 1, %s964_s21  }
  0x68   : > { %s27_s7 = ssub.s32 %s964_s21, %s1145_s28  ;;  %s30_s8 = sadd.s32 1, %s960_s20 }
  0x69   : > { %p28_p8 = scmp.eq.s32.totalorder %s27_s7, 0  ;;  %p37_p11 = scmp.ne.s32.totalorder %s960_s20, %s956_s19 }
  0x6a   : > { %p38_p1 = scmp.eq.s32.totalorder %s964_s21, 0  ;;  %p43_p3 = scmp.ne.s32.totalorder %s956_s19, %s952_s18 }
  0x6b   : > { %s1156_s27 = scalar_select %p28_p8, %s960_s20, %s30_s8  }
  0x6c   : > { %p1158_p12 = por %p38_p1, %p37_p11  ;;  %p1306_p13 = scmp.eq.s32.totalorder %s1030_s24, 0 }
  0x6d   : > { %p151_p0 = scmp.eq.s32.totalorder %s1030_s24, 1  ;;  %p157_p2 = scmp.eq.s32.totalorder %s597_s11, 1 }
  0x6e   : > { %p1164_p6 = por %p1306_p13, %p43_p3  ;;  %p683_p5 = scmp.lt.s32.totalorder %s964_s21, 2 }
  0x6f   : > { %s225_s23 = sand.u32 1, %s960_s20   ;;  %p1171_p7 = por %p151_p0, %p37_p11 }
  0x70   : > { %p1175_p9 = por %p157_p2, %p43_p3  ;;  %s604_s14 = sshll.u32 %s225_s23, 3 }
  0x71   : > { %s1308_s12 = scalar_select %p1171_p7, 1, 0 }
  0x72   : > { %s1309_s13 = scalar_select %p1175_p9, 1, 0 }
  0x73   : > { %s605_s15 = sshll.u32 %s964_s21, 7  ;;  %s229_s26 = scalar_lea.vmem [#allocation2], %s604_s14 }
  0x74   : > { %s1183_s22 = scalar_lea.hbm %s1293_s0, %s605_s15  ;;  %s236_s30 = sshll.u32 %s229_s26, 4  ;;  %s1185_s30 = int_to_ptr.vmem [resolvable:$true] %s236_s30 }
  0x75   : > { %p1189_p4 = pnand %p683_p5, %p1158_p12  ;;  %s226_s6 = scalar_lea.sflag [#allocation3], %s225_s23 }
  0x76   : > { %s860_s11 = scalar_lea.hbm %s1183_s22, 128  ;;  %s865_s14 = scalar_lea.hbm %s1293_s0, 256 }
  0x77   : > { %p861_p10 = scmp.ne.s32.totalorder %s1183_s22, %s860_s11  ;;  %p862_p8 = pneg %p1189_p4 }
  0x78   : > { %p866_p3 = scmp.lt.u32.totalorder %s1183_s22, %s1293_s0  ;;  %p867_p12 = scmp.lt.u32.totalorder %s865_s14, %s860_s11 }
  0x79   : > { %p863_p11 = pnand %p862_p8, %p861_p10  ;;  %p869_p0 = scmp.lt.u32.totalorder %s860_s11, %s1183_s22 }
  0x7a   : > { %p868_p13 = por %p867_p12, %p866_p3 }
  0x7b   : > { %p864_p1 = pneg %p863_p11 }
  0x7c   : > { %p870_p2 = por %p869_p0, %p868_p13 }
  0x7e   : > { %p871_p5 = pnand %p870_p2, %p864_p1 }
  0x80   : > { %874 = shalt.err (!%p871_p5)
}
  0x81   : > { %s875_s23 = scalar_lea.vmem %s1185_s30, 128  ;;  %s974_s16 = smov [#allocation2]  }
  0x82   : > { %p876_p10 = scmp.ne.s32.totalorder %s1185_s30, %s875_s23  ;;  %s880_s17 = sshll.u32 %s974_s16, 4  ;;  %s881_s17 = int_to_ptr.vmem [resolvable:$false] %s880_s17 }
  0x83   : > { %s882_s26 = scalar_lea.vmem %s881_s17, 256  ;;  %p883_p7 = scmp.lt.s32.totalorder %s1185_s30, %s881_s17 }
  0x84   : > { %p878_p11 = pnand %p876_p10, %p862_p8  ;;  %p884_p3 = scmp.lt.s32.totalorder %s882_s26, %s875_s23 }
  0x86   : > { %p879_p9 = pneg %p878_p11  ;;  %p885_p12 = por %p884_p3, %p883_p7 }
  0x88   : > { %p886_p13 = pnand %p885_p12, %p879_p9 }
  0x8a   : > { %889 = shalt.err (!%p886_p13)
}
  0x8b   : > { %674 = dma.hbm_to_vmem [thread:$0]  (!%p1189_p4), %s1183_s22, 128, %s1185_s30, %s226_s6  }
  0x8c   : > { %p1311_p1 = scmp.ne.s32.totalorder %s1302_s25, 0 }
  0x8d   : > { %s1221_s11 = sand.u32 (!%p1311_p1), 1, %s956_s19  }
  0x8e   : > { %245 = sbr.rel (%p1311_p1) target bundleno = 820 (0x334), region = 40  ;;  %s607_s7 = sshll.u32 (!%p1311_p1), %s1221_s11, 3 }
  0x8f   : > { %s248_s8 = scalar_lea.sflag (!%p1311_p1), [#allocation3], %s1221_s11  ;;  %s251_s14 = scalar_lea.vmem (!%p1311_p1), [#allocation2], %s607_s7 }
  0x95   : > { %935 = dma.done.wait (%p1164_p6), %s248_s8, 128  }
  0x96   : > { %937 = vsyncadd (%p1164_p6), %s248_s8, 4294967168  ;;  %p1312_p7 = scmp.eq.s32.totalorder %s1030_s24, 0 }
  0x98   : > { %939 = dma.done.wait (%p1312_p7), [#allocation6], 272   ;;  %p1313_p9 = pmov %p1312_p7 }
  0x99   : > { %p1314_p4 = pmov %p1312_p7 }
  0x9a   : > { %941 = vsyncadd (%p1313_p9), [#allocation6], 4294967024 }
  0x9b   : > { %943 = dma.done.wait (%p1314_p4), [#allocation9], 544   ;;  %p1315_p8 = pmov %p1314_p4 }
  0x9c   : > { %vm297_vm0 = vcmask 261120   ;;  %v296_v0 = vld [vmem:[%s251_s14] sm:$0xff]  ;;  %v732_v4 = vld [vmem:[#allocation5] sm:$0xff]   ;;  %v975_v5 = vmov 0.0   ;;  %vm976_vm1 = vmmov 0   ;;  %v733_v6 = vld [vmem:[#allocation5 + $0x8] sm:$0xff]   ;;  %v390_v32 = vlaneseq }
  0x9d   : > { %945 = vsyncadd (%p1315_p8), [#allocation9], 4294966752  ;;  %v298_v1 = vsel %vm297_vm0, %v296_v0, 0.0  ;;  %v303_v2 = vmul.f32 %v296_v0, %v296_v0  ;;  %630 = vmatprep.subr.bf16.mxu0 %v975_v5  ;;  %634 = vmatprep.mubr.msk.bf16.mxu0 %vm976_vm1, %v975_v5  ;;  %v734_v19 = vld [vmem:[#allocation8 + $0x4] ss:$8 sps:$4 sm:$0xff]   ;;  %v977_v22 = vmov 0  }
  0x9e   : > { %299 = vadd.xlane.f32.xlu0 %v298_v1  ;;  %631 = vmatpush3.bf16.msra.mxu0 %v732_v4  ;;  %v736_v20 = vld [vmem:[#allocation8] ss:$8 sps:$4 sm:$0xff]   ;;  %v737_v21 = vld [vmem:[#allocation8 + $0x14] ss:$8 sps:$4 sm:$0xff]   ;;  %v739_v23 = vld [vmem:[#allocation8 + $0x10] ss:$8 sps:$4 sm:$0xff]  }
  0x9f   : > { %v304_v3 = vsel %vm297_vm0, %v303_v2, 0.0  ;;  %632 = vmatprep.subr.bf16.mxu0 %v975_v5  ;;  %423 = vmatprep.subr.bf16.mxu1 %v734_v19  ;;  %v613_v24 = vld [vmem:[#allocation7] ss:$0 sm:$0xff]  ;;  %v391_v33 = vshrl.u32 %v390_v32, 7  ;;  %v388_v35 = vld [vmem:[#allocation10] sm:$0x3] }
  0xa0   : > { %455 = vmatprep.mubr.bf16.mxu1 %v977_v22  ;;  %424 = vmatpush1.bf16.msra.mxu1 %v736_v20  ;;  %s624_s25 = sshll.u32 %s1030_s24, 7  ;;  %s293_s10 = scalar_lea.vmem [#allocation11], %s607_s7 }
  0xa1   : > { %425 = vmatprep.subr.bf16.mxu1 %v737_v21  ;;  %v396_v34 = vsub.s32 1, %v391_v33  ;;  %v392_v46 = vsub.s32 0, %v391_v33  ;;  %s489_s22 = sshll.u32 %s293_s10, 4  ;;  %s1249_s6 = scalar_lea.hbm %s1298_s5, %s624_s25  ;;  %s1251_s22 = int_to_ptr.vmem [resolvable:$true] %s489_s22 }
  0xa2   : > { %305 = vadd.xlane.f32.xlu0 %v304_v3  ;;  %633 = vmatpush3.bf16.msra.mxu0 %v733_v6  ;;  %s476_s9 = scalar_lea.sflag [#allocation4], %s1221_s11  ;;  %s890_s15 = scalar_lea.vmem %s1251_s22, 128 }
  0xa3   : > { %v397_v36 = vrot.slane %v388_v35, %v396_v34  ;;  %v393_v47 = vrot.slane %v388_v35, %v392_v46  ;;  %p891_p6 = scmp.ne.s32.totalorder %s1251_s22, %s890_s15  ;;  %p1316_p0 = scmp.ne.s32.totalorder %s1308_s12, 0 }
  0xa4   : > { %426 = vmatpush1.bf16.msra.mxu1 %v739_v23  ;;  %s978_s24 = smov [#allocation11]  }
  0xa5   : > { %p892_p2 = pnand %p891_p6, %p1316_p0  ;;  %s894_s23 = sshll.u32 %s978_s24, 4  ;;  %s895_s23 = int_to_ptr.vmem [resolvable:$false] %s894_s23 }
  0xa6   : > { %s896_s16 = scalar_lea.vmem %s895_s23, 256  ;;  %p897_p10 = scmp.lt.s32.totalorder %s1251_s22, %s895_s23 }
  0xa7   : > { %p893_p5 = pneg %p892_p2  ;;  %p898_p11 = scmp.lt.s32.totalorder %s896_s16, %s890_s15 }
  0xa9   : > { %p899_p3 = por %p898_p11, %p897_p10 }
  0xab   : > { %p900_p12 = pnand %p899_p3, %p893_p5 }
 0x12b   : > { %v300_v7 = vpop.xlane.xlu0 %299 }
 0x12c   : > { %v302_v8 = vmul.f32 0.03125, %v300_v7 }
 0x12e   : > { %v308_v10 = vmul.f32 %v302_v8, %v302_v8  ;;  %v311_v15 = vsub.f32 %v296_v0, %v302_v8 }
 0x12f   : > { %v306_v9 = vpop.xlane.xlu0 %305 }
 0x130   : > { %v307_v11 = vmul.f32 0.03125, %v306_v9 }
 0x132   : > { %v309_v12 = vsub.f32 %v307_v11, %v308_v10 }
 0x134   : > { %v310_v13 = vmax.f32 %v309_v12, 0.0 }
 0x136   : > { %v312_v14 = vadd.f32 1e-05, %v310_v13 }
 0x138   : > { %740 = vrsqrt.f32 %v312_v14 }
 0x142   : > { %v741_v16 = vpop.eup %740 }
 0x143   : > { %v314_v17 = vmul.f32 %v741_v16, %v311_v15 }
 0x145   : > { %v315_v18 = vpack.c.bf16 %v314_v17, %v314_v17 }
 0x147   : > { %635 = vmatmul.mubr.msk.bf16.vlgmr.msra.gmra.mrb[0].mxu0 %vm297_vm0, %v315_v18 }
 0x21a   : > { %v376_v25 = vpop.f32.mrb[0].mxu0 }
 0x21b   : > { %v377_v26 = vadd.f32 %v613_v24, %v376_v25  ;;  %v636_v27 = vpop.f32.mrb[1].mxu0 }
 0x21c   : > { %v379_v28 = vpop.f32.mrb[2].mxu0 }
 0x21d   : > { %v382_v29 = vpack.c.bf16 %v377_v26, %v377_v26  ;;  %v637_v30 = vpop.f32.mrb[3].mxu0 }
 0x21f   : > { %742 = vtanh.bf16 %v382_v29 }
 0x22a   : > { %v743_v31 = vpop.eup %742 }
 0x22b   : > { %621 = vmatmul.mubr.msk.bf16.vlgmr.msra.gmra.mrb[0].mxu1 %vm297_vm0, %v743_v31 }
 0x2fe   : > { %v457_v37 = vpop.f32.mrb[0].mxu1 }
 0x2ff   : > { %v459_v38 = vpop.f32.mrb[1].mxu1  ;;  %v458_v50 = vadd.f32 %v457_v37, %v393_v47 }
 0x300   : > { %v460_v39 = vadd.f32 %v459_v38, %v397_v36  ;;  %v461_v40 = vpop.f32.mrb[2].mxu1 }
 0x301   : > { %v462_v41 = vpop.f32.mrb[3].mxu1 }
 0x302   : > { %v464_v42 = vpack.c.bf16 %v460_v39, %v460_v39 }
 0x304   : > { %v622_v43 = vmul.bf16 3216621497, %v464_v42 }
 0x306   : > { %744 = vpow.bf16 %v622_v43 }
 0x311   : > { %v745_v44 = vpop.eup %744 }
 0x312   : > { %v469_v45 = vadd.bf16 1065369472, %v745_v44 }
 0x314   : > { %746 = vrcp.bf16 %v469_v45 }
 0x31f   : > { %v747_v48 = vpop.eup %746 }
 0x320   : > { %v471_v49 = vmul.bf16 1065369472, %v747_v48 }
 0x322   : > { %v472_v51 = vunpack.c.l.bf16 %v471_v49 }
 0x324   : > { %v473_v52 = vmul.f32 %v472_v51, %v458_v50 }
 0x326   : > { %474 = vst [vmem:[%s293_s10] sm:$0xff] %v473_v52 }
 0x327   : > { %903 = shalt.err (!%p900_p12)
}
 0x328   : > { %s904_s17 = scalar_lea.hbm %s1249_s6, 128  ;;  %s908_s7 = scalar_lea.hbm %s1298_s5, 256 }
 0x329   : > { %p905_p13 = scmp.ne.s32.totalorder %s1249_s6, %s904_s17  ;;  %p909_p9 = scmp.lt.u32.totalorder %s1249_s6, %s1298_s5 }
 0x32a   : > { %p910_p4 = scmp.lt.u32.totalorder %s908_s7, %s904_s17  ;;  %p912_p6 = scmp.lt.u32.totalorder %s904_s17, %s1249_s6 }
 0x32b   : > { %p906_p1 = pnand %p905_p13, %p1316_p0 }
 0x32c   : > { %p911_p8 = por %p910_p4, %p909_p9 }
 0x32d   : > { %p907_p7 = pneg %p906_p1 }
 0x32e   : > { %p913_p2 = por %p912_p6, %p911_p8 }
 0x330   : > { %p914_p5 = pnand %p913_p2, %p907_p7 }
 0x332   : > { %917 = shalt.err (!%p914_p5)
}
 0x333   : > { %656 = dma.vmem_to_hbm [thread:$0]  (%p1316_p0), %s1251_s22, 128, %s1249_s6, %s476_s9  }
 0x334 PF: > { %s501_s25 = sand.u32 1, %s952_s18   ;;  %p1317_p10 = scmp.ne.s32.totalorder %s1309_s13, 0 }
 0x335   : > { %p1318_p11 = scmp.ge.s32.totalorder %s964_s21, 2  ;;  %s502_s10 = scalar_lea.sflag [#allocation4], %s501_s25 }
 0x337   : > { %p676_p3 = pnand %p1318_p11, %p1317_p10 }
 0x339   : > { %947 = dma.done.wait (!%p676_p3), %s502_s10, 128  }
 0x33a   : > { %949 = vsyncadd (!%p676_p3), %s502_s10, 4294967168  ;;  %p20_p12 = scmp.ge.s32.totalorder %s1145_s28, 4   ;;  %s1319_s18 = smov %s956_s19 }
 0x33b   : > { %s1320_s19 = smov %s960_s20  ;;  %s1321_s20 = smov %s1156_s27 }
 0x33c   : > { %s1322_s21 = smov %s1145_s28  ;;  %22 = sbr.rel (!%p20_p12) target bundleno = 7 (0x7), region = 101 }
 0x343   :  { %507 = vsyncpa [#allocation3], 1 }
 0x344   :  { %509 = vsyncpa [#allocation3 + $0x1], 1 }
 0x345   :  { %510 = vsyncpa [#allocation6], 1 }
 0x346   :  { %511 = vsyncpa [#allocation9], 1 }
 0x347   :  { %512 = vsyncpa [#allocation4], 1 }
 0x348   :  { %514 = vsyncpa [#allocation4 + $0x1], 1 }

</bundles_post_ra>
